<compile_context>
chip_gen: v6e
topology: v6e:2x2x1
jax: 0.10.0
libtpu: 0.0.40
codegen_flags: <defaults>
</compile_context>

<pallas_src>
import jax
import jax.numpy as jnp
from jax.experimental import pallas as pl
from jax.experimental.pallas import tpu as pltpu

FEAT = 256        # encoder feature dim (projector input)
PROJ = 64         # projector output dim (as in the PyTorch module)
PROJ_PAD = 128    # lane-dense padded projector output dim
TM_CAP = 256      # row-tile cap: one full MXU pass on v6e/v7x, two on v5e


def _simclr_fused_kernel(xi_ref, xj_ref, we_ref, w1_ref, w2_ref,
                         hi_ref, hj_ref, zi_ref, zj_ref):
    """One (row-tile, K-tile) grid step of the fused SimCLR forward.

    Grid: (nm, nk) -- rows "parallel", K reduction last ("arbitrary").
      xi_ref/xj_ref : (tm, tk)   f32 tiles of the two flattened views
      we_ref        : (tk, 256)  bf16 encoder weight K-tile (stand-in encoder)
      w1_ref        : (256, 256) bf16 projector layer-1 weight (grid-invariant)
      w2_ref        : (256, 128) bf16 projector layer-2 weight, padded 64->128
      hi_ref/hj_ref : (tm, 256)  f32 encoder features (double as accumulators)
      zi_ref/zj_ref : (tm, 128)  f32 padded projections (first 64 cols real)
    """
    k = pl.program_id(1)

    @pl.when(k == 0)
    def _():
        hi_ref[...] = jnp.zeros_like(hi_ref)
        hj_ref[...] = jnp.zeros_like(hj_ref)

    # Encoder partial products: bf16 MXU inputs, f32 accumulation directly in
    # the K-resident h outputs.  The bf16 cast rides a VPU slot under the MXU.
    we = we_ref[...]
    hi_ref[...] += jnp.dot(xi_ref[...].astype(we.dtype), we,
                           preferred_element_type=jnp.float32)
    hj_ref[...] += jnp.dot(xj_ref[...].astype(we.dtype), we,
                           preferred_element_type=jnp.float32)

    @pl.when(k == pl.num_programs(1) - 1)
    def _():
        # Projector epilogue: z = relu(h @ W1.T) @ W2.T  (f32 ReLU / acc).
        w1 = w1_ref[...]
        w2 = w2_ref[...]
        for h_ref, z_ref in ((hi_ref, zi_ref), (hj_ref, zj_ref)):
            a = jnp.dot(h_ref[...].astype(w1.dtype), w1,
                        preferred_element_type=jnp.float32)
            a = jnp.maximum(a, 0.0)
            z = jnp.dot(a.astype(w2.dtype), w2,
                        preferred_element_type=jnp.float32)
            z_ref[...] = z.astype(z_ref.dtype)


def _round_up(x, m):
    return (x + m - 1) // m * m


def _vmem_budget():
    """Generation-aware (scoped-VMEM limit, K-tile cap)."""
    try:
        info = pltpu.get_tpu_info()
        vmem = int(getattr(info, "vmem_capacity_bytes", 64 * 1024 * 1024))
    except Exception:
        vmem = 64 * 1024 * 1024                         # conservative fallback
    if vmem >= 100 * 1024 * 1024:                       # v5e / v6e: 128 MiB
        return 96 * 1024 * 1024, 4096
    return 48 * 1024 * 1024, 2048                       # v7x: 64 MiB physical


def simclr_forward_fused(x_i, x_j, we_t, w1_t, w2_t_pad, *, tm=None, tk=None):
    """x_i, x_j: (B, D_in) float32.  Returns f32 (h_i, h_j, z_i_pad, z_j_pad)."""
    B, d_in = x_i.shape
    assert x_j.shape == (B, d_in)
    feat = we_t.shape[1]
    proj_pad = w2_t_pad.shape[1]

    vmem_limit, tk_cap = _vmem_budget()

    # --- K (reduction) tiling: multiple of 128; zero-pad D_in up to it. ---
    if tk is None:
        tk = tk_cap
    tk = min(tk, _round_up(d_in, 128))
    tk = _round_up(tk, 128)
    d_pad = _round_up(d_in, tk)
    if d_pad != d_in:
        # TODO(synk): for very large awkward D_in a masked last K tile would
        # avoid this extra zero-pad pass; padding keeps tk bounded and simple.
        x_i = jnp.pad(x_i, ((0, 0), (0, d_pad - d_in)))
        x_j = jnp.pad(x_j, ((0, 0), (0, d_pad - d_in)))
        we_t = jnp.pad(we_t, ((0, d_pad - d_in), (0, 0)))
    nk = d_pad // tk

    # --- Row ("parallel") tiling: cap at one MXU pass; pad the batch up. ---
    if tm is None:
        tm = B if B <= TM_CAP else TM_CAP
    b_pad = _round_up(B, tm)
    if b_pad != B:
        x_i = jnp.pad(x_i, ((0, b_pad - B), (0, 0)))
        x_j = jnp.pad(x_j, ((0, b_pad - B), (0, 0)))
    nm = b_pad // tm

    flops = (2 * 2 * b_pad * d_pad * feat              # encoder, both branches
             + 2 * 2 * b_pad * feat * feat             # projector layer 1
             + 2 * 2 * b_pad * feat * proj_pad)        # projector layer 2 (padded)
    bytes_accessed = (2 * b_pad * d_pad * 4                     # x_i + x_j (f32)
                      + nm * d_pad * feat * 2                   # encoder W per row-tile
                      + (feat * feat + feat * proj_pad) * 2     # W1 + W2
                      + 2 * b_pad * feat * 4                    # h_i + h_j
                      + 2 * b_pad * proj_pad * 4)               # z_i + z_j

    grid_spec = pltpu.PrefetchScalarGridSpec(
        num_scalar_prefetch=0,
        grid=(nm, nk),                                   # reduction axis last
        in_specs=[
            pl.BlockSpec((tm, tk), lambda m, k: (m, k)),           # x_i tile
            pl.BlockSpec((tm, tk), lambda m, k: (m, k)),           # x_j tile
            pl.BlockSpec((tk, feat), lambda m, k: (k, 0)),         # encoder W tile
            pl.BlockSpec((feat, feat), lambda m, k: (0, 0)),       # W1 (resident)
            pl.BlockSpec((feat, proj_pad), lambda m, k: (0, 0)),   # W2 (resident)
        ],
        out_specs=(
            pl.BlockSpec((tm, feat), lambda m, k: (m, 0)),         # h_i (acc)
            pl.BlockSpec((tm, feat), lambda m, k: (m, 0)),         # h_j (acc)
            pl.BlockSpec((tm, proj_pad), lambda m, k: (m, 0)),     # z_i (lane-dense)
            pl.BlockSpec((tm, proj_pad), lambda m, k: (m, 0)),     # z_j (lane-dense)
        ),
    )

    h_i, h_j, z_i, z_j = pl.pallas_call(
        _simclr_fused_kernel,
        out_shape=(jax.ShapeDtypeStruct((b_pad, feat), jnp.float32),
                   jax.ShapeDtypeStruct((b_pad, feat), jnp.float32),
                   jax.ShapeDtypeStruct((b_pad, proj_pad), jnp.float32),
                   jax.ShapeDtypeStruct((b_pad, proj_pad), jnp.float32)),
        grid_spec=grid_spec,
        compiler_params=pltpu.CompilerParams(
            dimension_semantics=("parallel", "arbitrary"),
            vmem_limit_bytes=vmem_limit),
        cost_estimate=pl.CostEstimate(flops=flops, transcendentals=0,
                                      bytes_accessed=bytes_accessed),
    )(x_i, x_j, we_t, w1_t, w2_t_pad)
    return h_i[:B], h_j[:B], z_i[:B], z_j[:B]


class SimCLRPallas:
    """JAX/Pallas equivalent of the PyTorch SimCLR module (forward pass)."""

    def __init__(self, in_dim, key, *, tm=None, tk=None):
        k_enc, k1, k2 = jax.random.split(key, 3)
        # Stand-in encoder weight (see TODO at top of file).
        we = jax.random.normal(k_enc, (FEAT, in_dim), jnp.float32) * 0.02
        # Projector weights: PyTorch nn.Linear stores (out, in); fwd is x @ W.T.
        w1 = jax.random.normal(k1, (FEAT, FEAT), jnp.float32) * 0.05
        w2 = jax.random.normal(k2, (PROJ, FEAT), jnp.float32) * 0.05
        # Pre-transpose once (x @ W.T layout) and cast to bf16 for the MXU.
        self.we_t = jnp.transpose(we).astype(jnp.bfloat16)       # (in_dim, 256)
        self.w1_t = jnp.transpose(w1).astype(jnp.bfloat16)       # (256, 256)
        w2_t = jnp.transpose(w2).astype(jnp.bfloat16)            # (256, 64)
        # Zero-pad the projector output 64 -> 128 so the z store is lane-dense.
        self.w2_t_pad = (jnp.zeros((FEAT, PROJ_PAD), jnp.bfloat16)
                         .at[:, :PROJ].set(w2_t))
        self.tm, self.tk = tm, tk

    def __call__(self, x_i, x_j):
        B = x_i.shape[0]
        # Flatten only (no concat, no bf16 cast): the kernel reads f32 and
        # casts in-VPU, halving input HBM traffic vs. the old concat+cast pass.
        xi = x_i.reshape(B, -1).astype(jnp.float32)
        xj = x_j.reshape(B, -1).astype(jnp.float32)
        h_i, h_j, z_i, z_j = simclr_forward_fused(
            xi, xj, self.we_t, self.w1_t, self.w2_t_pad, tm=self.tm, tk=self.tk)
        return h_i, h_j, z_i[:, :PROJ], z_j[:, :PROJ]


if __name__ == "__main__":
    key = jax.random.PRNGKey(0)
    k_model, k_xi, k_xj = jax.random.split(key, 3)

    # Small shapes: batch=2, channels=4, spatial=16x16 (NCHW like PyTorch).
    B, C, H, W = 2, 4, 16, 16
    x_i = jax.random.normal(k_xi, (B, C, H, W), jnp.float32)
    x_j = jax.random.normal(k_xj, (B, C, H, W), jnp.float32)

    # tk=256 forces a 4-step K pipeline even at this toy D_in=1024 so the
    # accumulate-into-h / pl.when epilogue path is exercised.
    model = SimCLRPallas(in_dim=C * H * W, key=k_model, tk=256)
    h_i, h_j, z_i, z_j = model(x_i, x_j)
    jax.block_until_ready((h_i, h_j, z_i, z_j))

    # Reference in plain JAX using the same bf16 weights (f32 math).
    we_f = model.we_t.astype(jnp.float32)
    w1_f = model.w1_t.astype(jnp.float32)
    w2_f = model.w2_t_pad[:, :PROJ].astype(jnp.float32)
    hp = jax.lax.Precision.HIGHEST

    def ref_branch(x):
        xf = x.reshape(B, -1).astype(jnp.bfloat16).astype(jnp.float32)
        h = jnp.dot(xf, we_f, precision=hp)
        a = jnp.maximum(
            jnp.dot(h.astype(jnp.bfloat16).astype(jnp.float32), w1_f, precision=hp),
            0.0)
        z = jnp.dot(a.astype(jnp.bfloat16).astype(jnp.float32), w2_f, precision=hp)
        return h, z

    rh_i, rz_i = ref_branch(x_i)
    rh_j, rz_j = ref_branch(x_j)
    assert h_i.shape == (B, FEAT) and h_j.shape == (B, FEAT)
    assert z_i.shape == (B, PROJ) and z_j.shape == (B, PROJ)
    for got, ref in ((h_i, rh_i), (h_j, rh_j), (z_i, rz_i), (z_j, rz_j)):
        assert jnp.allclose(got, ref, atol=1e-2, rtol=1e-2), \
            float(jnp.max(jnp.abs(got - ref)))

    print("KERNEL_OK")
</pallas_src>

<mosaic_0001>
module attributes {stable_mosaic.version = 11 : i64} {
  func.func @_simclr_fused_kernel(%arg0: i32, %arg1: i32, %arg2: memref<2x256xf32, #tpu.memory_space<vmem>>, %arg3: memref<2x256xf32, #tpu.memory_space<vmem>>, %arg4: memref<256x256xbf16, #tpu.memory_space<vmem>>, %arg5: memref<256x256xbf16, #tpu.memory_space<vmem>>, %arg6: memref<256x128xbf16, #tpu.memory_space<vmem>>, %arg7: memref<2x256xf32, #tpu.memory_space<vmem>>, %arg8: memref<2x256xf32, #tpu.memory_space<vmem>>, %arg9: memref<2x128xf32, #tpu.memory_space<vmem>>, %arg10: memref<2x128xf32, #tpu.memory_space<vmem>>) attributes {dimension_semantics = [#tpu.dimension_semantics<parallel>, #tpu.dimension_semantics<arbitrary>], iteration_bounds = array<i64: 1, 4>, scalar_prefetch = 0 : i64, scratch_operands = 0 : i64, tpu.core_type = #tpu.core_type<tc>, window_params = [{transform_indices = @transform_0, window_bounds = array<i64: 2, 256>}, {transform_indices = @transform_1, window_bounds = array<i64: 2, 256>}, {transform_indices = @transform_2, window_bounds = array<i64: 256, 256>}, {pipeline_mode = #tpu.pipeline_mode<synchronous>, transform_indices = @transform_3, window_bounds = array<i64: 256, 256>}, {pipeline_mode = #tpu.pipeline_mode<synchronous>, transform_indices = @transform_4, window_bounds = array<i64: 256, 128>}, {transform_indices = @transform_5, window_bounds = array<i64: 2, 256>}, {transform_indices = @transform_6, window_bounds = array<i64: 2, 256>}, {transform_indices = @transform_7, window_bounds = array<i64: 2, 128>}, {transform_indices = @transform_8, window_bounds = array<i64: 2, 128>}]} {
    %c0_i32 = arith.constant 0 : i32
    %0 = arith.cmpi eq, %arg1, %c0_i32 : i32
    %1 = arith.extui %0 : i1 to i32
    %c0_i32_0 = arith.constant 0 : i32
    %2 = arith.cmpi ne, %1, %c0_i32_0 : i32
    scf.if %2 {
      %cst_16 = arith.constant 0.000000e+00 : f32
      %19 = vector.broadcast %cst_16 : f32 to vector<2x256xf32>
      %c0_17 = arith.constant 0 : index
      %c0_18 = arith.constant 0 : index
      %20 = vector.load %arg7[%c0_17, %c0_18] : memref<2x256xf32, #tpu.memory_space<vmem>>, vector<2x256xf32>
      tpu.vector_store %arg7[%c0_17, %c0_18], %19 {strides = array<i32>} : memref<2x256xf32, #tpu.memory_space<vmem>>, vector<2x256xf32>,
      %cst_19 = arith.constant 0.000000e+00 : f32
      %21 = vector.broadcast %cst_19 : f32 to vector<2x256xf32>
      %c0_20 = arith.constant 0 : index
      %c0_21 = arith.constant 0 : index
      %22 = vector.load %arg8[%c0_20, %c0_21] : memref<2x256xf32, #tpu.memory_space<vmem>>, vector<2x256xf32>
      tpu.vector_store %arg8[%c0_20, %c0_21], %21 {strides = array<i32>} : memref<2x256xf32, #tpu.memory_space<vmem>>, vector<2x256xf32>,
    } else {
    }
    %c0 = arith.constant 0 : index
    %c0_1 = arith.constant 0 : index
    %3 = vector.load %arg4[%c0, %c0_1] : memref<256x256xbf16, #tpu.memory_space<vmem>>, vector<256x256xbf16>
    %c0_2 = arith.constant 0 : index
    %c0_3 = arith.constant 0 : index
    %4 = vector.load %arg7[%c0_2, %c0_3] : memref<2x256xf32, #tpu.memory_space<vmem>>, vector<2x256xf32>
    %c0_4 = arith.constant 0 : index
    %c0_5 = arith.constant 0 : index
    %5 = vector.load %arg2[%c0_4, %c0_5] : memref<2x256xf32, #tpu.memory_space<vmem>>, vector<2x256xf32>
    %6 = arith.truncf %5 : vector<2x256xf32> to vector<2x256xbf16>
    %cst = arith.constant dense<0.000000e+00> : vector<2x256xf32>
    %7 = tpu.matmul %6, %3, %cst {dimension_numbers = #tpu.dot_dimension_numbers<[1], [0], [0], [1], [0, 0, 1, 1], [], []>} : vector<2x256xbf16>, vector<256x256xbf16>, vector<2x256xf32> -> vector<2x256xf32>
    %8 = arith.addf %4, %7 : vector<2x256xf32>
    %c0_6 = arith.constant 0 : index
    %c0_7 = arith.constant 0 : index
    %9 = vector.load %arg7[%c0_6, %c0_7] : memref<2x256xf32, #tpu.memory_space<vmem>>, vector<2x256xf32>
    tpu.vector_store %arg7[%c0_6, %c0_7], %8 {strides = array<i32>} : memref<2x256xf32, #tpu.memory_space<vmem>>, vector<2x256xf32>,
    %c0_8 = arith.constant 0 : index
    %c0_9 = arith.constant 0 : index
    %10 = vector.load %arg8[%c0_8, %c0_9] : memref<2x256xf32, #tpu.memory_space<vmem>>, vector<2x256xf32>
    %c0_10 = arith.constant 0 : index
    %c0_11 = arith.constant 0 : index
    %11 = vector.load %arg3[%c0_10, %c0_11] : memref<2x256xf32, #tpu.memory_space<vmem>>, vector<2x256xf32>
    %12 = arith.truncf %11 : vector<2x256xf32> to vector<2x256xbf16>
    %cst_12 = arith.constant dense<0.000000e+00> : vector<2x256xf32>
    %13 = tpu.matmul %12, %3, %cst_12 {dimension_numbers = #tpu.dot_dimension_numbers<[1], [0], [0], [1], [0, 0, 1, 1], [], []>} : vector<2x256xbf16>, vector<256x256xbf16>, vector<2x256xf32> -> vector<2x256xf32>
    %14 = arith.addf %10, %13 : vector<2x256xf32>
    %c0_13 = arith.constant 0 : index
    %c0_14 = arith.constant 0 : index
    %15 = vector.load %arg8[%c0_13, %c0_14] : memref<2x256xf32, #tpu.memory_space<vmem>>, vector<2x256xf32>
    tpu.vector_store %arg8[%c0_13, %c0_14], %14 {strides = array<i32>} : memref<2x256xf32, #tpu.memory_space<vmem>>, vector<2x256xf32>,
    %c3_i32 = arith.constant 3 : i32
    %16 = arith.cmpi eq, %arg1, %c3_i32 : i32
    %17 = arith.extui %16 : i1 to i32
    %c0_i32_15 = arith.constant 0 : i32
    %18 = arith.cmpi ne, %17, %c0_i32_15 : i32
    scf.if %18 {
      %c0_16 = arith.constant 0 : index
      %c0_17 = arith.constant 0 : index
      %19 = vector.load %arg5[%c0_16, %c0_17] : memref<256x256xbf16, #tpu.memory_space<vmem>>, vector<256x256xbf16>
      %c0_18 = arith.constant 0 : index
      %c0_19 = arith.constant 0 : index
      %20 = vector.load %arg6[%c0_18, %c0_19] : memref<256x128xbf16, #tpu.memory_space<vmem>>, vector<256x128xbf16>
      %c0_20 = arith.constant 0 : index
      %c0_21 = arith.constant 0 : index
      %21 = vector.load %arg7[%c0_20, %c0_21] : memref<2x256xf32, #tpu.memory_space<vmem>>, vector<2x256xf32>
      %22 = arith.truncf %21 : vector<2x256xf32> to vector<2x256xbf16>
      %cst_22 = arith.constant dense<0.000000e+00> : vector<2x256xf32>
      %23 = tpu.matmul %22, %19, %cst_22 {dimension_numbers = #tpu.dot_dimension_numbers<[1], [0], [0], [1], [0, 0, 1, 1], [], []>} : vector<2x256xbf16>, vector<256x256xbf16>, vector<2x256xf32> -> vector<2x256xf32>
      %cst_23 = arith.constant 0.000000e+00 : f32
      %24 = vector.broadcast %cst_23 : f32 to vector<2x256xf32>
      %25 = arith.maximumf %23, %24 : vector<2x256xf32>
      %26 = arith.truncf %25 : vector<2x256xf32> to vector<2x256xbf16>
      %cst_24 = arith.constant dense<0.000000e+00> : vector<2x128xf32>
      %27 = tpu.matmul %26, %20, %cst_24 {dimension_numbers = #tpu.dot_dimension_numbers<[1], [0], [0], [1], [0, 0, 1, 1], [], []>} : vector<2x256xbf16>, vector<256x128xbf16>, vector<2x128xf32> -> vector<2x128xf32>
      %c0_25 = arith.constant 0 : index
      %c0_26 = arith.constant 0 : index
      %28 = vector.load %arg9[%c0_25, %c0_26] : memref<2x128xf32, #tpu.memory_space<vmem>>, vector<2x128xf32>
      tpu.vector_store %arg9[%c0_25, %c0_26], %27 {strides = array<i32>} : memref<2x128xf32, #tpu.memory_space<vmem>>, vector<2x128xf32>,
      %c0_27 = arith.constant 0 : index
      %c0_28 = arith.constant 0 : index
      %29 = vector.load %arg8[%c0_27, %c0_28] : memref<2x256xf32, #tpu.memory_space<vmem>>, vector<2x256xf32>
      %30 = arith.truncf %29 : vector<2x256xf32> to vector<2x256xbf16>
      %cst_29 = arith.constant dense<0.000000e+00> : vector<2x256xf32>
      %31 = tpu.matmul %30, %19, %cst_29 {dimension_numbers = #tpu.dot_dimension_numbers<[1], [0], [0], [1], [0, 0, 1, 1], [], []>} : vector<2x256xbf16>, vector<256x256xbf16>, vector<2x256xf32> -> vector<2x256xf32>
      %cst_30 = arith.constant 0.000000e+00 : f32
      %32 = vector.broadcast %cst_30 : f32 to vector<2x256xf32>
      %33 = arith.maximumf %31, %32 : vector<2x256xf32>
      %34 = arith.truncf %33 : vector<2x256xf32> to vector<2x256xbf16>
      %cst_31 = arith.constant dense<0.000000e+00> : vector<2x128xf32>
      %35 = tpu.matmul %34, %20, %cst_31 {dimension_numbers = #tpu.dot_dimension_numbers<[1], [0], [0], [1], [0, 0, 1, 1], [], []>} : vector<2x256xbf16>, vector<256x128xbf16>, vector<2x128xf32> -> vector<2x128xf32>
      %c0_32 = arith.constant 0 : index
      %c0_33 = arith.constant 0 : index
      %36 = vector.load %arg10[%c0_32, %c0_33] : memref<2x128xf32, #tpu.memory_space<vmem>>, vector<2x128xf32>
      tpu.vector_store %arg10[%c0_32, %c0_33], %35 {strides = array<i32>} : memref<2x128xf32, #tpu.memory_space<vmem>>, vector<2x128xf32>,
    } else {
    }
    return
  }
  func.func @transform_0(%arg0: i32, %arg1: i32) -> (i32, i32) {
    %c0_i32 = arith.constant 0 : i32
    return %arg0, %arg1 : i32, i32
  }
  func.func @transform_1(%arg0: i32, %arg1: i32) -> (i32, i32) {
    %c0_i32 = arith.constant 0 : i32
    return %arg0, %arg1 : i32, i32
  }
  func.func @transform_2(%arg0: i32, %arg1: i32) -> (i32, i32) {
    %c0_i32 = arith.constant 0 : i32
    %c0_i32_0 = arith.constant 0 : i32
    return %arg1, %c0_i32 : i32, i32
  }
  func.func @transform_3(%arg0: i32, %arg1: i32) -> (i32, i32) {
    %c0_i32 = arith.constant 0 : i32
    %c0_i32_0 = arith.constant 0 : i32
    %c0_i32_1 = arith.constant 0 : i32
    return %c0_i32, %c0_i32_0 : i32, i32
  }
  func.func @transform_4(%arg0: i32, %arg1: i32) -> (i32, i32) {
    %c0_i32 = arith.constant 0 : i32
    %c0_i32_0 = arith.constant 0 : i32
    %c0_i32_1 = arith.constant 0 : i32
    return %c0_i32, %c0_i32_0 : i32, i32
  }
  func.func @transform_5(%arg0: i32, %arg1: i32) -> (i32, i32) {
    %c0_i32 = arith.constant 0 : i32
    %c0_i32_0 = arith.constant 0 : i32
    return %arg0, %c0_i32 : i32, i32
  }
  func.func @transform_6(%arg0: i32, %arg1: i32) -> (i32, i32) {
    %c0_i32 = arith.constant 0 : i32
    %c0_i32_0 = arith.constant 0 : i32
    return %arg0, %c0_i32 : i32, i32
  }
  func.func @transform_7(%arg0: i32, %arg1: i32) -> (i32, i32) {
    %c0_i32 = arith.constant 0 : i32
    %c0_i32_0 = arith.constant 0 : i32
    return %arg0, %c0_i32 : i32, i32
  }
  func.func @transform_8(%arg0: i32, %arg1: i32) -> (i32, i32) {
    %c0_i32 = arith.constant 0 : i32
    %c0_i32_0 = arith.constant 0 : i32
    return %arg0, %c0_i32 : i32, i32
  }
}

</mosaic_0001>

<bundles_post_ra>
// kernel: tpu_custom_call.1
= control target key start
LH: loop header
LB: loop body
LE: loop exit
PB: predicated region body
PF: predicated region fallthrough
CT: control target
= control target key end

     0   :  { %s2713_s0 = inlined_call_operand.hbm [shape: f32[2,1024], index: 0, kind: input, shape index: {}]   ;;  %s2714_s1 = inlined_call_operand.hbm [shape: f32[2,1024], index: 1, kind: input, shape index: {}]   ;;  %s2715_s2 = inlined_call_operand.hbm [shape: bf16[1024,256], index: 2, kind: input, shape index: {}]   ;;  %s2716_s3 = inlined_call_operand.hbm [shape: bf16[256,256], index: 3, kind: input, shape index: {}]   ;;  %s2717_s4 = inlined_call_operand.hbm [shape: bf16[256,128], index: 4, kind: input, shape index: {}]   ;;  %s2718_s5 = inlined_call_operand.hbm [shape: f32[2,256], index: 5, kind: output, shape index: {0}]   ;;  %s2719_s6 = inlined_call_operand.hbm [shape: f32[2,256], index: 6, kind: output, shape index: {1}]   ;;  %s2720_s7 = inlined_call_operand.hbm [shape: f32[2,128], index: 7, kind: output, shape index: {2}]   ;;  %s2721_s8 = inlined_call_operand.hbm [shape: f32[2,128], index: 8, kind: output, shape index: {3}]  }
   0x1   :  { %2728 = sst [smem:[#allocation27_spill]] %s2714_s1 }
   0x2   :  { %2729 = sst [smem:[#allocation28_spill]] %s2716_s3 }
   0x3   :  { %2730 = sst [smem:[#allocation29_spill]] %s2720_s7 }
   0x4   :  { %2731 = sst [smem:[#allocation30_spill]] %s2721_s8 }
   0x5   :  { %14 = vsyncpa [#allocation3], 0 }
   0x6   :  { %16 = vsyncpa [#allocation3 + $0x1], 0 }
   0x7   :  { %17 = vsyncpa [#allocation6], 0 }
   0x8   :  { %19 = vsyncpa [#allocation6 + $0x1], 0 }
   0x9   :  { %20 = vsyncpa [#allocation9], 0 }
   0xa   :  { %21 = vsyncpa [#allocation4], 0 }
   0xb   :  { %22 = vsyncpa [#allocation13], 0 }
   0xc   :  { %23 = vsyncpa [#allocation16], 0  ;;  %s2291_s27 = smov 0   ;;  %s2293_s28 = smov 0  }
   0xd   :  { %s2295_s29 = smov 0   ;;  %s2297_s30 = smov 0  }
   0xe   :  { %s2299_s9 = smov 0   ;;  %s2301_s10 = smov 0  }
   0xf LB: > { %2732 = sst [smem:[#allocation23_spill]] %s2217_s29  ;;  %s2320_s11 = sadd.s32 4294967295, %s2229_s10   ;;  %s2229_s10 = sphi %s2301_s10, %s29_s10   ;;  %s2225_s9 = sphi %s2299_s9, %s2754_s9   ;;  %s2221_s30 = sphi %s2297_s30, %s2753_s30   ;;  %s2217_s29 = sphi %s2295_s29, %s2749_s29   ;;  %s2213_s28 = sphi %s2293_s28, %s2752_s28   ;;  %s2209_s27 = sphi %s2291_s27, %s2751_s27  }
  0x10   : > { %2733 = sst [smem:[#allocation24_spill]] %s2229_s10  ;;  %p63_p0 = scmp.ne.s32.totalorder %s2213_s28, %s2209_s27 }
  0x11   : > { %p64_p1 = scmp.eq.s32.totalorder %s2320_s11, 0  ;;  %p1531_p2 = scmp.ge.s32.totalorder %s2229_s10, 1 }
  0x12   : > { %p274_p3 = scmp.lt.s32.totalorder %s2229_s10, 5  ;;  %s2231_s14 = smov [#allocation8]  }
  0x13   : > { %p2328_p4 = por %p64_p1, %p63_p0  ;;  %s286_s15 = sshll.u32 %s2231_s14, 4  ;;  %s287_s15 = int_to_ptr.vmem [resolvable:$true] %s286_s15 }
  0x14   : > { %p2332_p5 = pnand %p1531_p2, %p274_p3  ;;  %s38_s17 = sadd.s32 1, %s2225_s9 }
  0x15   : > { %s1938_s18 = scalar_lea.vmem %s287_s15, 4096  ;;  %p1946_p12 = scmp.lt.s32.totalorder %s287_s15, %s287_s15 }
  0x16   : > { %p1725_p6 = pneg %p2332_p5  ;;  %p1939_p9 = scmp.ne.s32.totalorder %s287_s15, %s1938_s18 }
  0x17   : > { %p1947_p13 = scmp.lt.s32.totalorder %s1938_s18, %s1938_s18 }
  0x18   : > { %p2340_p7 = pnand %p1725_p6, %p64_p1 }
  0x19   : > { %p1948_p0 = por %p1947_p13, %p1946_p12 }
  0x1a   : > { %p1929_p8 = pneg %p2340_p7 }
  0x1c   : > { %p1941_p10 = pnand %p1939_p9, %p1929_p8 }
  0x1e   : > { %p1942_p11 = pneg %p1941_p10 }
  0x20   : > { %p1949_p2 = pnand %p1948_p0, %p1942_p11 }
  0x22   : > { %1952 = shalt.err (!%p1949_p2)
}
  0x23   : > { %s2722_s19 = smov 128   ;;  %s2723_s20 = smov 8  }
  0x24   : > { %s2737_s3 = sld [smem:[#allocation28_spill]]  ;;  %p39_p3 = scmp.ge.s32.totalorder %s38_s17, 4 }
  0x25   : > { %s50_s23 = sadd.s32 1, %s2217_s29  ;;  %p57_p6 = scmp.ne.s32.totalorder %s2217_s29, %s2213_s28 }
  0x26   : > { %p58_p9 = scmp.eq.s32.totalorder %s2229_s10, 0  ;;  %s2756_s17 = smov (%p39_p3, %s38_s17), 0 }
  0x27   : > { %2738 = sst [smem:[#allocation25_spill]] %s2756_s17  ;;  %p1744_p11 = scmp.lt.s32.totalorder %s2229_s10, 4 }
  0x28   : > { %p59_p10 = por %p58_p9, %p57_p6  ;;  %s46_s24 = ssub.s32 %s2225_s9, %s2756_s17 }
  0x29   : > { %s2368_s25 = sand.u32 1, %s2217_s29   ;;  %p48_p12 = scmp.eq.s32.totalorder %s46_s24, 0 }
  0x2a   : > { %1728 = dma.hbm_to_vmem [thread:$0]  (!%p2340_p7), %s2737_s3, 4096, %s287_s15, [#allocation9], %s2722_s19, %s2722_s19, %s2723_s20  }
  0x2b   : > { %s2725_s26 = sshll.u32 %s2368_s25, 2  ;;  %s1647_s27 = sshll.u32 %s2225_s9, 6 }
  0x2c   : > { %p2372_p13 = pnand %p1744_p11, %p59_p10  ;;  %s334_s18 = sand.u32 1, %s2229_s10  }
  0x2d   : > { %s2377_s15 = scalar_select %p48_p12, %s2217_s29, %s50_s23  }
  0x2e   : > { %s2741_s1 = sld [smem:[#allocation27_spill]]  ;;  %s338_s20 = scalar_lea.vmem [#allocation5], %s2725_s26 }
  0x2f   : > { %2740 = sst [smem:[#allocation26_spill]] %s2377_s15  ;;  %s348_s3 = sshll.u32 %s338_s20, 4  ;;  %s349_s3 = int_to_ptr.vmem [resolvable:$true] %s348_s3 }
  0x30   : > { %s1541_s24 = sshll.u32 %s2368_s25, 8  ;;  %s2388_s17 = scalar_lea.sflag [#allocation6], %s334_s18 }
  0x31   : > { %p1955_p0 = pneg %p2372_p13  ;;  %s1966_s8 = scalar_lea.vmem %s349_s3, 64 }
  0x32   : > { %p1967_p2 = scmp.ne.s32.totalorder %s349_s3, %s1966_s8  ;;  %s2234_s23 = smov [#allocation5]  }
  0x33   : > { %s1971_s15 = sshll.u32 %s2234_s23, 4  ;;  %s1972_s15 = int_to_ptr.vmem [resolvable:$false] %s1971_s15 }
  0x34   : > { %s346_s19 = scalar_lea.hbm %s2741_s1, %s1647_s27  ;;  %p1969_p3 = pnand %p1967_p2, %p1955_p0 }
  0x35   : > { %s1973_s21 = scalar_lea.vmem %s1972_s15, 128  ;;  %p1974_p9 = scmp.lt.s32.totalorder %s349_s3, %s1972_s15 }
  0x36   : > { %p1970_p6 = pneg %p1969_p3  ;;  %p1975_p10 = scmp.lt.s32.totalorder %s1973_s21, %s1966_s8 }
  0x38   : > { %p1976_p11 = por %p1975_p10, %p1974_p9 }
  0x3a   : > { %p1977_p12 = pnand %p1976_p11, %p1970_p6 }
  0x3c   : > { %1980 = shalt.err (!%p1977_p12)
}
  0x3d   : > { %1738 = dma.hbm_to_vmem [thread:$0]  (!%p2372_p13), %s346_s19, 64, %s349_s3, %s2388_s17  }
  0x3e   : > { %s359_s20 = scalar_lea.vmem [#allocation7], %s1541_s24  ;;  %s2235_s22 = smov [#allocation10]  }
  0x3f   : > { %s367_s18 = sshll.u32 %s359_s20, 4  ;;  %s299_s26 = sshll.u32 %s2235_s22, 4  ;;  %s2398_s18 = int_to_ptr.vmem [resolvable:$true] %s367_s18  ;;  %s300_s26 = int_to_ptr.vmem [resolvable:$true] %s299_s26 }
  0x40   : > { %s1992_s23 = scalar_lea.vmem %s300_s26, 2048  ;;  %p2000_p6 = scmp.lt.s32.totalorder %s300_s26, %s300_s26 }
  0x41   : > { %p1993_p2 = scmp.ne.s32.totalorder %s300_s26, %s1992_s23  ;;  %p2001_p10 = scmp.lt.s32.totalorder %s1992_s23, %s1992_s23 }
  0x43   : > { %p1995_p3 = pnand %p1993_p2, %p1929_p8  ;;  %p2002_p11 = por %p2001_p10, %p2000_p6 }
  0x45   : > { %p1996_p9 = pneg %p1995_p3 }
  0x47   : > { %p2003_p12 = pnand %p2002_p11, %p1996_p9 }
  0x49   : > { %2006 = shalt.err (!%p2003_p12)
}
  0x4a   : > { %s2236_s8 = smov 64   ;;  %s2237_s3 = smov 4  }
  0x4b   : > { %1731 = dma.hbm_to_vmem [thread:$0]  (!%p2340_p7), %s2717_s4, 2048, %s300_s26, [#allocation9], %s2236_s8, %s2236_s8, %s2237_s3  }
  0x4c   : > { %s325_s20 = scalar_lea.hbm %s2713_s0, %s1647_s27  ;;  %s2742_s22 = sshll.u32 %s2368_s25, 2 }
  0x4d   : > { %s317_s23 = scalar_lea.vmem [#allocation2], %s2742_s22  ;;  %s1650_s29 = sshll.u32 %s2225_s9, 12 }
  0x4e   : > { %s327_s1 = sshll.u32 %s317_s23, 4  ;;  %s314_s10 = scalar_lea.sflag [#allocation3], %s2368_s25  ;;  %s328_s1 = int_to_ptr.vmem [resolvable:$true] %s327_s1 }
  0x4f   : > { %s2020_s7 = scalar_lea.vmem %s328_s1, 64  ;;  %s2238_s16 = smov [#allocation2]  }
  0x50   : > { %p2021_p8 = scmp.ne.s32.totalorder %s328_s1, %s2020_s7  ;;  %s2025_s19 = sshll.u32 %s2238_s16, 4  ;;  %s2026_s19 = int_to_ptr.vmem [resolvable:$false] %s2025_s19 }
  0x51   : > { %s2027_s26 = scalar_lea.vmem %s2026_s19, 128  ;;  %p2028_p7 = scmp.lt.s32.totalorder %s328_s1, %s2026_s19 }
  0x52   : > { %p2023_p2 = pnand %p2021_p8, %p1955_p0  ;;  %p2029_p9 = scmp.lt.s32.totalorder %s2027_s26, %s2020_s7 }
  0x54   : > { %p2024_p3 = pneg %p2023_p2  ;;  %p2030_p6 = por %p2029_p9, %p2028_p7 }
  0x56   : > { %p2031_p10 = pnand %p2030_p6, %p2024_p3 }
  0x58   : > { %2034 = shalt.err (!%p2031_p10)
}
  0x59   : > { %1735 = dma.hbm_to_vmem [thread:$0]  (!%p2372_p13), %s325_s20, 64, %s328_s1, %s314_s10  }
  0x5a   : > { %s366_s8 = scalar_lea.hbm %s2715_s2, %s1650_s29  ;;  %s2048_s3 = scalar_lea.vmem %s2398_s18, 4096 }
  0x5b   : > { %p2049_p11 = scmp.ne.s32.totalorder %s2398_s18, %s2048_s3  ;;  %s2239_s7 = smov [#allocation7]  }
  0x5c   : > { %s2053_s15 = sshll.u32 %s2239_s7, 4  ;;  %s2054_s15 = int_to_ptr.vmem [resolvable:$false] %s2053_s15 }
  0x5d   : > { %p2051_p12 = pnand %p2049_p11, %p1955_p0  ;;  %s2055_s24 = scalar_lea.vmem %s2054_s15, 8192 }
  0x5e   : > { %p2056_p2 = scmp.lt.s32.totalorder %s2398_s18, %s2054_s15  ;;  %p2057_p3 = scmp.lt.s32.totalorder %s2055_s24, %s2048_s3 }
  0x5f   : > { %p2052_p8 = pneg %p2051_p12 }
  0x60   : > { %p2058_p7 = por %p2057_p3, %p2056_p2 }
  0x62   : > { %p2059_p9 = pnand %p2058_p7, %p2052_p8 }
  0x64   : > { %2062 = shalt.err (!%p2059_p9)
}
  0x65   : > { %s2743_s1 = smov 8   ;;  %s2744_s10 = smov 128  }
  0x66   : > { %1741 = dma.hbm_to_vmem [thread:$0]  (!%p2372_p13), %s366_s8, 4096, %s2398_s18, %s2388_s17, %s2744_s10, %s2744_s10, %s2743_s1  }
  0x67   : > { %379 = sbr.rel (%p2332_p5) target bundleno = 1180 (0x49c), region = 40  ;;  %s381_s29 = sand.u32 (!%p2332_p5), 1, %s2213_s28  }
  0x68   : > { %s1546_s21 = sshll.u32 (!%p2332_p5), %s381_s29, 2  ;;  %s382_s20 = scalar_lea.sflag (!%p2332_p5), [#allocation3], %s381_s29 }
  0x69   : > { %s2441_s22 = scalar_lea.vmem (!%p2332_p5), [#allocation2], %s1546_s21 }
  0x6c   : > { %2184 = dma.done.wait (%p2328_p4), %s382_s20, 64  }
  0x6d   : > { %2186 = vsyncadd (%p2328_p4), %s382_s20, 4294967232  ;;  %s390_s14 = sand.u32 1, %s2320_s11   ;;  %s2448_s17 = scalar_lea.vmem [#allocation5], %s1546_s21 }
  0x6e   : > { %s391_s23 = scalar_lea.sflag [#allocation6], %s390_s14 }
  0x6f   : > { %2188 = dma.done.wait (%p2328_p4), %s391_s23, 4160  }
  0x70   : > { %2190 = vsyncadd (%p2328_p4), %s391_s23, 4294963136  ;;  %s1548_s13 = sshll.u32 %s381_s29, 8 }
  0x71   : > { %s2454_s18 = scalar_lea.vmem [#allocation7], %s1548_s13 }
  0x72   : > { %2192 = dma.done.wait (%p64_p1), [#allocation9], 6144  }
  0x73   : > { %2194 = vsyncadd (%p64_p1), [#allocation9], 4294961152  ;;  %p1551_p5 = scmp.ne.s32.totalorder %s2221_s30, 0 }
  0x75   : > { %456 = sbr.rel (%p1551_p5) target bundleno = 124 (0x7c), region = 64 }
  0x7a   : > { %v2240_v0 = vmov 0.0  }
  0x7b   : > { %457 = vst [vmem:[#allocation11] sm:$0xf] %v2240_v0  ;;  %458 = vst [vmem:[#allocation12] sm:$0xf] %v2240_v0 }
  0x7c PF: > { %v1815_v1 = vld [vmem:[%s2454_s18 + $0x74] ss:$8 sps:$4 sm:$0xff]   ;;  %v1817_v2 = vld [vmem:[%s2454_s18 + $0x70] ss:$8 sps:$4 sm:$0xff]   ;;  %v1818_v3 = vld [vmem:[%s2454_s18 + $0x64] ss:$8 sps:$4 sm:$0xff]   ;;  %v713_v43 = vlaneseq }
  0x7d   : > { %666 = vmatprep.subr.bf16.mxu0 %v1815_v1  ;;  %735 = vmatprep.subr.bf16.mxu1 %v1815_v1  ;;  %v1820_v4 = vld [vmem:[%s2454_s18 + $0x60] ss:$8 sps:$4 sm:$0xff]   ;;  %v1821_v5 = vld [vmem:[%s2454_s18 + $0x54] ss:$8 sps:$4 sm:$0xff]   ;;  %v1823_v6 = vld [vmem:[%s2454_s18 + $0x50] ss:$8 sps:$4 sm:$0xff]  }
  0x7e   : > { %667 = vmatpush1.bf16.msra.mxu0 %v1817_v2  ;;  %736 = vmatpush1.bf16.msra.mxu1 %v1817_v2  ;;  %v1824_v7 = vld [vmem:[%s2454_s18 + $0x44] ss:$8 sps:$4 sm:$0xff]   ;;  %v1826_v8 = vld [vmem:[%s2454_s18 + $0x40] ss:$8 sps:$4 sm:$0xff]   ;;  %v1827_v9 = vld [vmem:[%s2454_s18 + $0x34] ss:$8 sps:$4 sm:$0xff]  }
  0x7f   : > { %668 = vmatprep.subr.bf16.mxu0 %v1818_v3  ;;  %737 = vmatprep.subr.bf16.mxu1 %v1818_v3  ;;  %v1829_v10 = vld [vmem:[%s2454_s18 + $0x30] ss:$8 sps:$4 sm:$0xff]   ;;  %v1830_v11 = vld [vmem:[%s2454_s18 + $0x24] ss:$8 sps:$4 sm:$0xff]   ;;  %v1832_v12 = vld [vmem:[%s2454_s18 + $0x20] ss:$8 sps:$4 sm:$0xff]  }
  0x80   : > { %v1833_v13 = vld [vmem:[%s2454_s18 + $0x14] ss:$8 sps:$4 sm:$0xff]   ;;  %v1835_v17 = vld [vmem:[%s2454_s18 + $0x10] ss:$8 sps:$4 sm:$0xff]   ;;  %v1836_v19 = vld [vmem:[%s2454_s18 + $0x4] ss:$8 sps:$4 sm:$0xff]  }
  0x81   : > { %v2475_v14 = vld.sshfl [vmem:[%s2441_s22] sm:$0x33 pattern:$0x76325410]  ;;  %v1838_v22 = vld [vmem:[%s2454_s18] ss:$8 sps:$4 sm:$0xff]  }
  0x82   : > { %669 = vmatpush1.bf16.msra.mxu0 %v1820_v4  ;;  %738 = vmatpush1.bf16.msra.mxu1 %v1820_v4  ;;  %v501_v15 = vcombine.high %v2475_v14, %v2475_v14  ;;  %v2480_v16 = vld.sshfl [vmem:[%s2448_s17] sm:$0x33 pattern:$0x76325410]  ;;  %v1842_v25 = vld [vmem:[%s2454_s18 + $0xe4] ss:$8 sps:$4 sm:$0xff]   ;;  %v504_v39 = vpack.c.bf16 %v2475_v14, %v2475_v14 }
  0x83   : > { %670 = vmatprep.subr.bf16.mxu0 %v1821_v5  ;;  %739 = vmatprep.subr.bf16.mxu1 %v1821_v5  ;;  %v730_v18 = vcombine.high %v2480_v16, %v2480_v16  ;;  %v1839_v23 = vld [vmem:[%s2454_s18 + $0xf4] ss:$8 sps:$4 sm:$0xff]   ;;  %v1841_v24 = vld [vmem:[%s2454_s18 + $0xf0] ss:$8 sps:$4 sm:$0xff]   ;;  %v1844_v26 = vld [vmem:[%s2454_s18 + $0xe0] ss:$8 sps:$4 sm:$0xff]   ;;  %v733_v40 = vpack.c.bf16 %v2480_v16, %v2480_v16 }
  0x84   : > { %v505_v20 = vpack.c.bf16 %v501_v15, %v501_v15  ;;  %v1845_v27 = vld [vmem:[%s2454_s18 + $0xd4] ss:$8 sps:$4 sm:$0xff]   ;;  %v1847_v28 = vld [vmem:[%s2454_s18 + $0xd0] ss:$8 sps:$4 sm:$0xff]   ;;  %v1848_v29 = vld [vmem:[%s2454_s18 + $0xc4] ss:$8 sps:$4 sm:$0xff]  }
  0x85   : > { %v734_v21 = vpack.c.bf16 %v730_v18, %v730_v18  ;;  %v1850_v30 = vld [vmem:[%s2454_s18 + $0xc0] ss:$8 sps:$4 sm:$0xff]   ;;  %v1851_v31 = vld [vmem:[%s2454_s18 + $0xb4] ss:$8 sps:$4 sm:$0xff]   ;;  %v1853_v32 = vld [vmem:[%s2454_s18 + $0xb0] ss:$8 sps:$4 sm:$0xff]  }
  0x86   : > { %671 = vmatpush1.bf16.msra.mxu0 %v1823_v6  ;;  %740 = vmatpush1.bf16.msra.mxu1 %v1823_v6  ;;  %v1854_v33 = vld [vmem:[%s2454_s18 + $0xa4] ss:$8 sps:$4 sm:$0xff]   ;;  %v1856_v34 = vld [vmem:[%s2454_s18 + $0xa0] ss:$8 sps:$4 sm:$0xff]   ;;  %v1857_v35 = vld [vmem:[%s2454_s18 + $0x94] ss:$8 sps:$4 sm:$0xff]  }
  0x87   : > { %672 = vmatprep.subr.bf16.mxu0 %v1824_v7  ;;  %741 = vmatprep.subr.bf16.mxu1 %v1824_v7  ;;  %v1859_v36 = vld [vmem:[%s2454_s18 + $0x90] ss:$8 sps:$4 sm:$0xff]   ;;  %v1860_v37 = vld [vmem:[%s2454_s18 + $0x84] ss:$8 sps:$4 sm:$0xff]   ;;  %v1862_v38 = vld [vmem:[%s2454_s18 + $0x80] ss:$8 sps:$4 sm:$0xff]  }
  0x88   : > { %698 = vmatprep.mubr.bf16.mxu0 %v505_v20  ;;  %767 = vmatprep.mubr.bf16.mxu1 %v734_v21  ;;  %v2241_v41 = vmov 1983009808   ;;  %v714_v45 = vshrl.u32 %v713_v43, 7  ;;  %v491_v53 = vld [vmem:[#allocation11] sm:$0xf]  ;;  %p1586_p1 = scmp.ne.s32.totalorder %s2221_s30, 3 }
  0x89   : > { %v711_v42 = vunpack.c.l.s4 %v2241_v41  ;;  %v720_v54 = vld [vmem:[#allocation12] sm:$0xf] }
  0x8a   : > { %673 = vmatpush1.bf16.msra.mxu0 %v1826_v8  ;;  %742 = vmatpush1.bf16.msra.mxu1 %v1826_v8 }
  0x8b   : > { %674 = vmatprep.subr.bf16.mxu0 %v1827_v9  ;;  %743 = vmatprep.subr.bf16.mxu1 %v1827_v9  ;;  %v712_v44 = vunpack.c.0.s8 %v711_v42 }
  0x8d   : > { %v715_v48 = vsub.s32 %v712_v44, %v714_v45 }
  0x8e   : > { %675 = vmatpush1.bf16.msra.mxu0 %v1829_v10  ;;  %744 = vmatpush1.bf16.msra.mxu1 %v1829_v10 }
  0x8f   : > { %676 = vmatprep.subr.bf16.mxu0 %v1830_v11  ;;  %745 = vmatprep.subr.bf16.mxu1 %v1830_v11 }
  0x92   : > { %677 = vmatpush1.bf16.msra.mxu0 %v1832_v12  ;;  %746 = vmatpush1.bf16.msra.mxu1 %v1832_v12 }
  0x93   : > { %678 = vmatprep.subr.bf16.mxu0 %v1833_v13  ;;  %747 = vmatprep.subr.bf16.mxu1 %v1833_v13 }
  0x96   : > { %679 = vmatpush1.bf16.msra.mxu0 %v1835_v17  ;;  %748 = vmatpush1.bf16.msra.mxu1 %v1835_v17 }
  0x97   : > { %680 = vmatprep.subr.bf16.mxu0 %v1836_v19  ;;  %749 = vmatprep.subr.bf16.mxu1 %v1836_v19 }
  0x9a   : > { %681 = vmatpush1.bf16.msra.mxu0 %v1838_v22  ;;  %750 = vmatpush1.bf16.msra.mxu1 %v1838_v22 }
  0x9b   : > { %682 = vmatprep.subr.bf16.mxu0 %v1839_v23  ;;  %751 = vmatprep.subr.bf16.mxu1 %v1839_v23 }
  0x9e   : > { %683 = vmatpush2.bf16.msra.mxu0 %v1841_v24  ;;  %752 = vmatpush2.bf16.msra.mxu1 %v1841_v24 }
  0x9f   : > { %684 = vmatprep.subr.bf16.mxu0 %v1842_v25  ;;  %753 = vmatprep.subr.bf16.mxu1 %v1842_v25 }
  0xa2   : > { %685 = vmatpush2.bf16.msra.mxu0 %v1844_v26  ;;  %754 = vmatpush2.bf16.msra.mxu1 %v1844_v26 }
  0xa3   : > { %686 = vmatprep.subr.bf16.mxu0 %v1845_v27  ;;  %755 = vmatprep.subr.bf16.mxu1 %v1845_v27 }
  0xa6   : > { %687 = vmatpush2.bf16.msra.mxu0 %v1847_v28  ;;  %756 = vmatpush2.bf16.msra.mxu1 %v1847_v28 }
  0xa7   : > { %688 = vmatprep.subr.bf16.mxu0 %v1848_v29  ;;  %757 = vmatprep.subr.bf16.mxu1 %v1848_v29 }
  0xaa   : > { %689 = vmatpush2.bf16.msra.mxu0 %v1850_v30  ;;  %758 = vmatpush2.bf16.msra.mxu1 %v1850_v30 }
  0xab   : > { %690 = vmatprep.subr.bf16.mxu0 %v1851_v31  ;;  %759 = vmatprep.subr.bf16.mxu1 %v1851_v31 }
  0xae   : > { %691 = vmatpush2.bf16.msra.mxu0 %v1853_v32  ;;  %760 = vmatpush2.bf16.msra.mxu1 %v1853_v32 }
  0xaf   : > { %692 = vmatprep.subr.bf16.mxu0 %v1854_v33  ;;  %761 = vmatprep.subr.bf16.mxu1 %v1854_v33 }
  0xb2   : > { %693 = vmatpush2.bf16.msra.mxu0 %v1856_v34  ;;  %762 = vmatpush2.bf16.msra.mxu1 %v1856_v34 }
  0xb3   : > { %694 = vmatprep.subr.bf16.mxu0 %v1857_v35  ;;  %763 = vmatprep.subr.bf16.mxu1 %v1857_v35 }
  0xb6   : > { %695 = vmatpush2.bf16.msra.mxu0 %v1859_v36  ;;  %764 = vmatpush2.bf16.msra.mxu1 %v1859_v36 }
  0xb7   : > { %696 = vmatprep.subr.bf16.mxu0 %v1860_v37  ;;  %765 = vmatprep.subr.bf16.mxu1 %v1860_v37 }
  0xba   : > { %697 = vmatpush2.bf16.msra.mxu0 %v1862_v38  ;;  %766 = vmatpush2.bf16.msra.mxu1 %v1862_v38 }
  0xbd   : > { %699 = vmatmul.mubr.bf16.vlgmr.msra.gmra.mxu0 %v504_v39  ;;  %768 = vmatmul.mubr.bf16.vlgmr.msra.gmra.mxu1 %v733_v40 }
 0x17d   : > { %v700_v46 = vpop.f32.mrf.mxu0  ;;  %v769_v47 = vpop.f32.mrf.mxu1 }
 0x17f   : > { %v702_v49 = vpop.f32.mrf.mxu0  ;;  %v771_v50 = vpop.f32.mrf.mxu1 }
 0x180   : > { %v709_v51 = vcombine.low %v700_v46, %v702_v49  ;;  %v778_v52 = vcombine.low %v769_v47, %v771_v50 }
 0x181   : > { %v704_v55 = vpop.f32.mrf.mxu0  ;;  %v773_v56 = vpop.f32.mrf.mxu1 }
 0x182   : > { %v716_v57 = vrot.slane %v709_v51, %v715_v48  ;;  %v785_v58 = vrot.slane %v778_v52, %v715_v48  ;;  %792 = sbr.rel (%p1586_p1) target bundleno = 1119 (0x45f), region = 68 }
 0x183   : > { %v705_v59 = vpop.f32.mrf.mxu0  ;;  %v774_v60 = vpop.f32.mrf.mxu1 }
 0x184   : > { %v718_v61 = vadd.f32 %v716_v57, %v491_v53  ;;  %v787_v62 = vadd.f32 %v785_v58, %v720_v54 }
 0x186   : > { %719 = vst [vmem:[#allocation11] sm:$0xf] %v718_v61  ;;  %788 = vst [vmem:[#allocation12] sm:$0xf] %v787_v62 }
 0x187   : > { %v2508_v63 = vld [vmem:[#allocation8 + $0x74] ss:$8 sps:$4 sm:$0xff]   ;;  %v2510_v0 = vld [vmem:[#allocation8 + $0x70] ss:$8 sps:$4 sm:$0xff]   ;;  %v2513_v1 = vld [vmem:[#allocation8 + $0x64] ss:$8 sps:$4 sm:$0xff]  }
 0x188   : > { %1031 = vmatprep.subr.bf16.mxu0 %v2508_v63  ;;  %v2516_v2 = vld [vmem:[#allocation8 + $0x60] ss:$8 sps:$4 sm:$0xff]   ;;  %v2519_v3 = vld [vmem:[#allocation8 + $0x54] ss:$8 sps:$4 sm:$0xff]   ;;  %v2522_v4 = vld [vmem:[#allocation8 + $0x50] ss:$8 sps:$4 sm:$0xff]  }
 0x189   : > { %1032 = vmatpush1.bf16.msra.mxu0 %v2510_v0  ;;  %v2525_v5 = vld [vmem:[#allocation8 + $0x44] ss:$8 sps:$4 sm:$0xff]   ;;  %v2528_v6 = vld [vmem:[#allocation8 + $0x40] ss:$8 sps:$4 sm:$0xff]   ;;  %v2531_v7 = vld [vmem:[#allocation8 + $0x34] ss:$8 sps:$4 sm:$0xff]  }
 0x18a   : > { %1033 = vmatprep.subr.bf16.mxu0 %v2513_v1  ;;  %v2534_v8 = vld [vmem:[#allocation8 + $0x30] ss:$8 sps:$4 sm:$0xff]   ;;  %v2537_v9 = vld [vmem:[#allocation8 + $0x24] ss:$8 sps:$4 sm:$0xff]   ;;  %v2540_v10 = vld [vmem:[#allocation8 + $0x20] ss:$8 sps:$4 sm:$0xff]  }
 0x18b   : > { %v2543_v11 = vld [vmem:[#allocation8 + $0x14] ss:$8 sps:$4 sm:$0xff]   ;;  %v2545_v12 = vld [vmem:[#allocation8 + $0x10] ss:$8 sps:$4 sm:$0xff]   ;;  %v2549_v14 = vld [vmem:[#allocation8 + $0x4] ss:$8 sps:$4 sm:$0xff]  }
 0x18c   : > { %v2553_v16 = vld [vmem:[#allocation10 + $0x78] sm:$0xff]   ;;  %v2560_v19 = vld [vmem:[#allocation10 + $0x70] sm:$0xff]   ;;  %v1915_v21 = vld [vmem:[#allocation10 + $0x68] sm:$0xff]  }
 0x18d   : > { %1034 = vmatpush1.bf16.msra.mxu0 %v2516_v2  ;;  %v2547_v13 = vld.sshfl [vmem:[#allocation11] sm:$0x33 pattern:$0x76325410]  ;;  %v2556_v17 = vld [vmem:[#allocation10 + $0x38] sm:$0xff]   ;;  %1651 = vmatprep.subr.bf16.mxu1 %v2553_v16  ;;  %v1914_v20 = vld [vmem:[#allocation10 + $0x30] sm:$0xff]  }
 0x18e   : > { %1035 = vmatprep.subr.bf16.mxu0 %v2519_v3  ;;  %v866_v15 = vcombine.high %v2547_v13, %v2547_v13  ;;  %1652 = vmatpush3.bf16.msra.mxu1 %v2556_v17  ;;  %v2565_v22 = vld [vmem:[#allocation8] ss:$8 sps:$4 sm:$0xff]   ;;  %v2568_v23 = vld [vmem:[#allocation8 + $0xf4] ss:$8 sps:$4 sm:$0xff]   ;;  %v2571_v26 = vld [vmem:[#allocation8 + $0xf0] ss:$8 sps:$4 sm:$0xff]   ;;  %v869_v47 = vpack.c.bf16 %v2547_v13, %v2547_v13 }
 0x18f   : > { %1653 = vmatprep.subr.bf16.mxu1 %v2560_v19  ;;  %v1916_v24 = vld [vmem:[#allocation10 + $0x28] sm:$0xff]   ;;  %v1917_v25 = vld [vmem:[#allocation10 + $0x60] sm:$0xff]   ;;  %v2578_v30 = vld [vmem:[#allocation8 + $0xd4] ss:$8 sps:$4 sm:$0xff]  }
 0x190   : > { %v870_v18 = vpack.c.bf16 %v866_v15, %v866_v15  ;;  %v2574_v27 = vld [vmem:[#allocation8 + $0xe4] ss:$8 sps:$4 sm:$0xff]   ;;  %v2576_v28 = vld [vmem:[#allocation8 + $0xe0] ss:$8 sps:$4 sm:$0xff]   ;;  %v1919_v31 = vld [vmem:[#allocation10 + $0x58] sm:$0xff]  }
 0x191   : > { %1036 = vmatpush1.bf16.msra.mxu0 %v2522_v4  ;;  %v1918_v29 = vld [vmem:[#allocation10 + $0x20] sm:$0xff]   ;;  %v1920_v32 = vld [vmem:[#allocation10 + $0x18] sm:$0xff]   ;;  %v1921_v33 = vld [vmem:[#allocation10 + $0x50] sm:$0xff]  }
 0x192   : > { %1037 = vmatprep.subr.bf16.mxu0 %v2525_v5  ;;  %1063 = vmatprep.mubr.bf16.mxu0 %v870_v18  ;;  %v2583_v34 = vld [vmem:[#allocation8 + $0xd0] ss:$8 sps:$4 sm:$0xff]   ;;  %v2586_v35 = vld [vmem:[#allocation8 + $0xc4] ss:$8 sps:$4 sm:$0xff]   ;;  %v2589_v38 = vld [vmem:[#allocation8 + $0xc0] ss:$8 sps:$4 sm:$0xff]  }
 0x193   : > { %1654 = vmatpush3.bf16.msra.mxu1 %v1914_v20  ;;  %v1922_v36 = vld [vmem:[#allocation10 + $0x10] sm:$0xff]   ;;  %v1923_v37 = vld [vmem:[#allocation10 + $0x48] sm:$0xff]   ;;  %v1925_v49 = vld [vmem:[#allocation10 + $0x40] sm:$0xff]  }
 0x194   : > { %1655 = vmatprep.subr.bf16.mxu1 %v1915_v21  ;;  %v2592_v39 = vld [vmem:[#allocation8 + $0xb4] ss:$8 sps:$4 sm:$0xff]   ;;  %v2595_v40 = vld [vmem:[#allocation8 + $0xb0] ss:$8 sps:$4 sm:$0xff]   ;;  %v2598_v41 = vld [vmem:[#allocation8 + $0xa4] ss:$8 sps:$4 sm:$0xff]  }
 0x195   : > { %1038 = vmatpush1.bf16.msra.mxu0 %v2528_v6  ;;  %v2601_v42 = vld [vmem:[#allocation8 + $0xa0] ss:$8 sps:$4 sm:$0xff]   ;;  %v2604_v43 = vld [vmem:[#allocation8 + $0x94] ss:$8 sps:$4 sm:$0xff]   ;;  %v2607_v44 = vld [vmem:[#allocation8 + $0x90] ss:$8 sps:$4 sm:$0xff]  }
 0x196   : > { %1039 = vmatprep.subr.bf16.mxu0 %v2531_v7  ;;  %v2610_v45 = vld [vmem:[#allocation8 + $0x84] ss:$8 sps:$4 sm:$0xff]   ;;  %v2613_v46 = vld [vmem:[#allocation8 + $0x80] ss:$8 sps:$4 sm:$0xff]  }
 0x197   : > { %1656 = vmatpush3.bf16.msra.mxu1 %v1916_v24  ;;  %v1924_v48 = vld [vmem:[#allocation10 + $0x8] sm:$0xff]   ;;  %v1926_v50 = vld [vmem:[#allocation10] sm:$0xff]  }
 0x198   : > { %1657 = vmatprep.subr.bf16.mxu1 %v1917_v25  ;;  %v1636_v51 = vld.sshfl [vmem:[#allocation12] sm:$0x33 pattern:$0x76325410] }
 0x199   : > { %1040 = vmatpush1.bf16.msra.mxu0 %v2534_v8  ;;  %v1222_v53 = vcombine.high %v1636_v51, %v1636_v51  ;;  %v1225_v62 = vpack.c.bf16 %v1636_v51, %v1636_v51 }
 0x19a   : > { %1041 = vmatprep.subr.bf16.mxu0 %v2537_v9 }
 0x19b   : > { %1658 = vmatpush3.bf16.msra.mxu1 %v1918_v29  ;;  %v1226_v59 = vpack.c.bf16 %v1222_v53, %v1222_v53 }
 0x19c   : > { %1659 = vmatprep.subr.bf16.mxu1 %v1919_v31 }
 0x19d   : > { %1042 = vmatpush1.bf16.msra.mxu0 %v2540_v10 }
 0x19e   : > { %1043 = vmatprep.subr.bf16.mxu0 %v2543_v11 }
 0x19f   : > { %1660 = vmatpush3.bf16.msra.mxu1 %v1920_v32 }
 0x1a0   : > { %1661 = vmatprep.subr.bf16.mxu1 %v1921_v33 }
 0x1a1   : > { %1044 = vmatpush1.bf16.msra.mxu0 %v2545_v12 }
 0x1a2   : > { %1045 = vmatprep.subr.bf16.mxu0 %v2549_v14 }
 0x1a3   : > { %1662 = vmatpush3.bf16.msra.mxu1 %v1922_v36 }
 0x1a4   : > { %1663 = vmatprep.subr.bf16.mxu1 %v1923_v37 }
 0x1a5   : > { %1046 = vmatpush1.bf16.msra.mxu0 %v2565_v22 }
 0x1a6   : > { %1047 = vmatprep.subr.bf16.mxu0 %v2568_v23 }
 0x1a7   : > { %1664 = vmatpush3.bf16.msra.mxu1 %v1924_v48 }
 0x1a8   : > { %1665 = vmatprep.subr.bf16.mxu1 %v1925_v49 }
 0x1a9   : > { %1048 = vmatpush2.bf16.msra.mxu0 %v2571_v26 }
 0x1aa   : > { %1049 = vmatprep.subr.bf16.mxu0 %v2574_v27 }
 0x1ab   : > { %1666 = vmatpush3.bf16.msra.mxu1 %v1926_v50 }
 0x1ac   : > { %1227 = vmatprep.subr.bf16.mxu1 %v2508_v63 }
 0x1ad   : > { %1050 = vmatpush2.bf16.msra.mxu0 %v2576_v28 }
 0x1ae   : > { %1051 = vmatprep.subr.bf16.mxu0 %v2578_v30 }
 0x1b1   : > { %1052 = vmatpush2.bf16.msra.mxu0 %v2583_v34 }
 0x1b2   : > { %1053 = vmatprep.subr.bf16.mxu0 %v2586_v35 }
 0x1b5   : > { %1054 = vmatpush2.bf16.msra.mxu0 %v2589_v38 }
 0x1b6   : > { %1055 = vmatprep.subr.bf16.mxu0 %v2592_v39 }
 0x1b9   : > { %1056 = vmatpush2.bf16.msra.mxu0 %v2595_v40 }
 0x1ba   : > { %1057 = vmatprep.subr.bf16.mxu0 %v2598_v41 }
 0x1bd   : > { %1058 = vmatpush2.bf16.msra.mxu0 %v2601_v42 }
 0x1be   : > { %1059 = vmatprep.subr.bf16.mxu0 %v2604_v43 }
 0x1c1   : > { %1060 = vmatpush2.bf16.msra.mxu0 %v2607_v44 }
 0x1c2   : > { %1061 = vmatprep.subr.bf16.mxu0 %v2610_v45 }
 0x1c5   : > { %1062 = vmatpush2.bf16.msra.mxu0 %v2613_v46 }
 0x1c6   : > { %1673 = vmatprep.subr.bf16.mxu0 %v2553_v16 }
 0x1c8   : > { %1064 = vmatmul.mubr.bf16.vlgmr.msra.gmra.mxu0 %v869_v47 }
 0x1c9   : > { %1674 = vmatpush3.bf16.msra.mxu0 %v2556_v17 }
 0x1ca   : > { %1675 = vmatprep.subr.bf16.mxu0 %v2560_v19 }
 0x1cd   : > { %1676 = vmatpush3.bf16.msra.mxu0 %v1914_v20 }
 0x1ce   : > { %1677 = vmatprep.subr.bf16.mxu0 %v1915_v21 }
 0x1d1   : > { %1678 = vmatpush3.bf16.msra.mxu0 %v1916_v24 }
 0x1d2   : > { %1679 = vmatprep.subr.bf16.mxu0 %v1917_v25 }
 0x1d5   : > { %1680 = vmatpush3.bf16.msra.mxu0 %v1918_v29 }
 0x1d6   : > { %1681 = vmatprep.subr.bf16.mxu0 %v1919_v31 }
 0x1d9   : > { %1682 = vmatpush3.bf16.msra.mxu0 %v1920_v32 }
 0x1da   : > { %1683 = vmatprep.subr.bf16.mxu0 %v1921_v33 }
 0x1dd   : > { %1684 = vmatpush3.bf16.msra.mxu0 %v1922_v36 }
 0x1de   : > { %1685 = vmatprep.subr.bf16.mxu0 %v1923_v37 }
 0x1e1   : > { %1686 = vmatpush3.bf16.msra.mxu0 %v1924_v48 }
 0x1e2   : > { %1687 = vmatprep.subr.bf16.mxu0 %v1925_v49 }
 0x1e5   : > { %1688 = vmatpush3.bf16.msra.mxu0 %v1926_v50 }
 0x288   : > { %v1065_v52 = vpop.f32.mrf.mxu0 }
 0x289   : > { %v1072_v54 = vmax.f32 %v1065_v52, 0.0 }
 0x28a   : > { %v1067_v55 = vpop.f32.mrf.mxu0 }
 0x28b   : > { %v1073_v56 = vmax.f32 %v1067_v55, 0.0  ;;  %v1074_v60 = vpack.c.bf16 %v1072_v54, %v1072_v54 }
 0x28c   : > { %v1069_v57 = vpop.f32.mrf.mxu0 }
 0x28d   : > { %v1075_v58 = vpack.c.bf16 %v1073_v56, %v1073_v56 }
 0x28e   : > { %v1070_v61 = vpop.f32.mrf.mxu0 }
 0x28f   : > { %1204 = vmatprep.mubr.bf16.mxu1 %v1075_v58 }
 0x290   : > { %1205 = vmatmul.mubr.bf16.vlgmr.msra.gmra.mxu1 %v1074_v60 }
 0x291   : > { %1228 = vmatpush1.bf16.msra.mxu1 %v2510_v0  ;;  %1259 = vmatprep.mubr.bf16.mxu1 %v1226_v59 }
 0x292   : > { %1229 = vmatprep.subr.bf16.mxu1 %v2513_v1 }
 0x295   : > { %1230 = vmatpush1.bf16.msra.mxu1 %v2516_v2 }
 0x296   : > { %1231 = vmatprep.subr.bf16.mxu1 %v2519_v3 }
 0x299   : > { %1232 = vmatpush1.bf16.msra.mxu1 %v2522_v4 }
 0x29a   : > { %1233 = vmatprep.subr.bf16.mxu1 %v2525_v5 }
 0x29d   : > { %1234 = vmatpush1.bf16.msra.mxu1 %v2528_v6 }
 0x29e   : > { %1235 = vmatprep.subr.bf16.mxu1 %v2531_v7 }
 0x2a1   : > { %1236 = vmatpush1.bf16.msra.mxu1 %v2534_v8 }
 0x2a2   : > { %1237 = vmatprep.subr.bf16.mxu1 %v2537_v9 }
 0x2a5   : > { %1238 = vmatpush1.bf16.msra.mxu1 %v2540_v10 }
 0x2a6   : > { %1239 = vmatprep.subr.bf16.mxu1 %v2543_v11 }
 0x2a9   : > { %1240 = vmatpush1.bf16.msra.mxu1 %v2545_v12 }
 0x2aa   : > { %1241 = vmatprep.subr.bf16.mxu1 %v2549_v14 }
 0x2ad   : > { %1242 = vmatpush1.bf16.msra.mxu1 %v2565_v22 }
 0x2ae   : > { %1243 = vmatprep.subr.bf16.mxu1 %v2568_v23 }
 0x2b1   : > { %1244 = vmatpush2.bf16.msra.mxu1 %v2571_v26 }
 0x2b2   : > { %1245 = vmatprep.subr.bf16.mxu1 %v2574_v27 }
 0x2b5   : > { %1246 = vmatpush2.bf16.msra.mxu1 %v2576_v28 }
 0x2b6   : > { %1247 = vmatprep.subr.bf16.mxu1 %v2578_v30 }
 0x2b9   : > { %1248 = vmatpush2.bf16.msra.mxu1 %v2583_v34 }
 0x2ba   : > { %1249 = vmatprep.subr.bf16.mxu1 %v2586_v35 }
 0x2bd   : > { %1250 = vmatpush2.bf16.msra.mxu1 %v2589_v38 }
 0x2be   : > { %1251 = vmatprep.subr.bf16.mxu1 %v2592_v39 }
 0x2c1   : > { %1252 = vmatpush2.bf16.msra.mxu1 %v2595_v40 }
 0x2c2   : > { %1253 = vmatprep.subr.bf16.mxu1 %v2598_v41 }
 0x2c5   : > { %1254 = vmatpush2.bf16.msra.mxu1 %v2601_v42 }
 0x2c6   : > { %1255 = vmatprep.subr.bf16.mxu1 %v2604_v43 }
 0x2c9   : > { %1256 = vmatpush2.bf16.msra.mxu1 %v2607_v44 }
 0x2ca   : > { %1257 = vmatprep.subr.bf16.mxu1 %v2610_v45 }
 0x2cd   : > { %1258 = vmatpush2.bf16.msra.mxu1 %v2613_v46 }
 0x2d0   : > { %1260 = vmatmul.mubr.bf16.vlgmr.msra.gmra.mxu1 %v1225_v62 }
 0x350   : > { %v1667_v63 = vpop.f32.mrf.mxu1 }
 0x352   : > { %v1668_v0 = vpop.f32.mrf.mxu1 }
 0x353   : > { %v1669_v1 = vadd.f32 %v1668_v0, %v1667_v63 }
 0x354   : > { %v1670_v2 = vpop.f32.mrf.mxu1 }
 0x355   : > { %1212 = vst [vmem:[#allocation14] sm:$0x3] %v1669_v1 }
 0x356   : > { %v1671_v3 = vpop.f32.mrf.mxu1 }
 0x390   : > { %v1261_v4 = vpop.f32.mrf.mxu1 }
 0x391   : > { %v1268_v5 = vmax.f32 %v1261_v4, 0.0 }
 0x392   : > { %v1263_v6 = vpop.f32.mrf.mxu1 }
 0x393   : > { %v1269_v7 = vmax.f32 %v1263_v6, 0.0  ;;  %v1270_v10 = vpack.c.bf16 %v1268_v5, %v1268_v5 }
 0x394   : > { %v1265_v8 = vpop.f32.mrf.mxu1 }
 0x395   : > { %v1271_v9 = vpack.c.bf16 %v1269_v7, %v1269_v7 }
 0x396   : > { %v1266_v11 = vpop.f32.mrf.mxu1 }
 0x397   : > { %1304 = vmatprep.mubr.bf16.mxu0 %v1271_v9 }
 0x398   : > { %1305 = vmatmul.mubr.bf16.vlgmr.msra.gmra.mxu0 %v1270_v10 }
 0x458   : > { %v1689_v12 = vpop.f32.mrf.mxu0 }
 0x45a   : > { %v1690_v13 = vpop.f32.mrf.mxu0 }
 0x45b   : > { %v1691_v14 = vadd.f32 %v1690_v13, %v1689_v12 }
 0x45c   : > { %v1692_v15 = vpop.f32.mrf.mxu0 }
 0x45d   : > { %1312 = vst [vmem:[#allocation15] sm:$0x3] %v1691_v14 }
 0x45e   : > { %v1693_v16 = vpop.f32.mrf.mxu0 }
 0x45f PF: > { %p1747_p4 = scmp.eq.s32.totalorder %s2320_s11, 3  ;;  %s2242_s30 = smov [#allocation12]  }
 0x460   : > { %s1337_s12 = sshll.u32 %s2242_s30, 4  ;;  %s1338_s12 = int_to_ptr.vmem [resolvable:$true] %s1337_s12 }
 0x461   : > { %s2063_s16 = scalar_lea.vmem %s1338_s12, 64  ;;  %p2070_p10 = scmp.lt.s32.totalorder %s1338_s12, %s1338_s12 }
 0x462   : > { %p2064_p13 = scmp.ne.s32.totalorder %s1338_s12, %s2063_s16  ;;  %p2071_p11 = scmp.lt.s32.totalorder %s2063_s16, %s2063_s16 }
 0x464   : > { %p2065_p0 = pnand %p2064_p13, %p1747_p4  ;;  %p2072_p12 = por %p2071_p11, %p2070_p10 }
 0x466   : > { %p2066_p6 = pneg %p2065_p0 }
 0x468   : > { %p2073_p8 = pnand %p2072_p12, %p2066_p6 }
 0x46a   : > { %2076 = shalt.err (!%p2073_p8)
}
 0x46b   : > { %1712 = dma.vmem_to_hbm [thread:$0]  (%p1747_p4), %s1338_s12, 64, %s2719_s6, [#allocation13]  }
 0x46c   : > { %s2243_s25 = smov [#allocation11]   ;;  %s2244_s8 = smov [#allocation14]  }
 0x46d   : > { %s1323_s27 = sshll.u32 %s2243_s25, 4  ;;  %s1350_s3 = sshll.u32 %s2244_s8, 4  ;;  %s1324_s27 = int_to_ptr.vmem [resolvable:$true] %s1323_s27  ;;  %s1351_s3 = int_to_ptr.vmem [resolvable:$true] %s1350_s3 }
 0x46e   : > { %s2087_s7 = scalar_lea.vmem %s1324_s27, 64  ;;  %p2094_p9 = scmp.lt.s32.totalorder %s1324_s27, %s1324_s27 }
 0x46f   : > { %p2088_p2 = scmp.ne.s32.totalorder %s1324_s27, %s2087_s7  ;;  %p2095_p5 = scmp.lt.s32.totalorder %s2087_s7, %s2087_s7 }
 0x471   : > { %p2089_p3 = pnand %p2088_p2, %p1747_p4  ;;  %p2096_p1 = por %p2095_p5, %p2094_p9 }
 0x473   : > { %p2090_p7 = pneg %p2089_p3 }
 0x475   : > { %p2097_p13 = pnand %p2096_p1, %p2090_p7 }
 0x477   : > { %2100 = shalt.err (!%p2097_p13)
}
 0x478   : > { %1710 = dma.vmem_to_hbm [thread:$0]  (%p1747_p4), %s1324_s27, 64, %s2718_s5, [#allocation4]  }
 0x479   : > { %s2111_s1 = scalar_lea.vmem %s1351_s3, 32  ;;  %p2118_p11 = scmp.lt.s32.totalorder %s1351_s3, %s1351_s3 }
 0x47a   : > { %p2112_p0 = scmp.ne.s32.totalorder %s1351_s3, %s2111_s1  ;;  %p2119_p12 = scmp.lt.s32.totalorder %s2111_s1, %s2111_s1 }
 0x47c   : > { %p2113_p6 = pnand %p2112_p0, %p1747_p4  ;;  %p2120_p8 = por %p2119_p12, %p2118_p11 }
 0x47e   : > { %p2114_p10 = pneg %p2113_p6 }
 0x480   : > { %p2121_p2 = pnand %p2120_p8, %p2114_p10 }
 0x482   : > { %2124 = shalt.err (!%p2121_p2)
}
 0x483   : > { %s2745_s21 = sld [smem:[#allocation29_spill]]  ;;  %s2245_s20 = smov [#allocation15]  }
 0x484   : > { %s1363_s22 = sshll.u32 %s2245_s20, 4  ;;  %s1364_s22 = int_to_ptr.vmem [resolvable:$true] %s1363_s22 }
 0x485   : > { %s2135_s14 = scalar_lea.vmem %s1364_s22, 32  ;;  %p2142_p5 = scmp.lt.s32.totalorder %s1364_s22, %s1364_s22 }
 0x486   : > { %p2136_p3 = scmp.ne.s32.totalorder %s1364_s22, %s2135_s14  ;;  %p2143_p1 = scmp.lt.s32.totalorder %s2135_s14, %s2135_s14 }
 0x488   : > { %p2137_p7 = pnand %p2136_p3, %p1747_p4  ;;  %p2144_p13 = por %p2143_p1, %p2142_p5 }
 0x489   : > { %1714 = dma.vmem_to_hbm [thread:$0]  (%p1747_p4), %s1351_s3, 32, %s2745_s21, [#allocation13]  }
 0x48a   : > { %p2138_p9 = pneg %p2137_p7 }
 0x48c   : > { %p2145_p0 = pnand %p2144_p13, %p2138_p9 }
 0x48e   : > { %2148 = shalt.err (!%p2145_p0)
}
 0x48f   : > { %s2746_s13 = sld [smem:[#allocation30_spill]] }
 0x495   : > { %1716 = dma.vmem_to_hbm [thread:$0]  (%p1747_p4), %s1364_s22, 32, %s2746_s13, [#allocation16]  }
 0x496   : > { %2196 = dma.done.wait (%p1747_p4), [#allocation4], 64  }
 0x497   : > { %2198 = vsyncadd (%p1747_p4), [#allocation4], 4294967232 }
 0x498   : > { %2200 = dma.done.wait (%p1747_p4), [#allocation13], 96  }
 0x499   : > { %2202 = vsyncadd (%p1747_p4), [#allocation13], 4294967200 }
 0x49a   : > { %2204 = dma.done.wait (%p1747_p4), [#allocation16], 32  }
 0x49b   : > { %2206 = vsyncadd (%p1747_p4), [#allocation16], 4294967264 }
 0x49c PF: > { %s2747_s18 = sld [smem:[#allocation24_spill]]  ;;  %s2751_s27 = smov %s2213_s28 }
 0x49d   : > { %s2748_s30 = sld [smem:[#allocation23_spill]] }
 0x49e   : > { %s2749_s29 = sld [smem:[#allocation26_spill]] }
 0x49f   : > { %s2750_s12 = sld [smem:[#allocation25_spill]] }
 0x4a2   : > { %s29_s10 = sadd.s32 1, %s2747_s18  }
 0x4a3   : > { %p26_p6 = scmp.ge.s32.totalorder %s29_s10, 6   ;;  %s2752_s28 = smov %s2748_s30 }
 0x4a4   : > { %s2753_s30 = smov %s2225_s9 }
 0x4a5   : > { %s2754_s9 = smov %s2750_s12  ;;  %28 = sbr.rel (!%p26_p6) target bundleno = 15 (0xf), region = 145 }
 0x4aa   :  { %1388 = vsyncpa [#allocation3], 1 }
 0x4ab   :  { %1390 = vsyncpa [#allocation3 + $0x1], 1 }
 0x4ac   :  { %1391 = vsyncpa [#allocation6], 1 }
 0x4ad   :  { %1393 = vsyncpa [#allocation6 + $0x1], 1 }
 0x4ae   :  { %1394 = vsyncpa [#allocation9], 1 }
 0x4af   :  { %1395 = vsyncpa [#allocation4], 1 }
 0x4b0   :  { %1397 = vsyncpa [#allocation4 + $0x1], 1 }
 0x4b1   :  { %1398 = vsyncpa [#allocation13], 1 }
 0x4b2   :  { %1399 = vsyncpa [#allocation16], 1 }

</bundles_post_ra>
